<compile_context>
chip_gen: v7x
topology: tpu7x:2x2x1
jax: 0.10.0
libtpu: 0.0.40
codegen_flags: <defaults>
</compile_context>

<pallas_src>
import jax
import jax.numpy as jnp
from jax.experimental import pallas as pl
from jax.experimental.pallas import tpu as pltpu

HIDDEN = 200       # LazyLinear(200)
OUT = 7            # LazyLinear(7)
HIDDEN_PAD = 256   # padded to multiple of 128 for MXU alignment
OUT_PAD = 128      # padded so the output store is lane-dense (128 lanes)


# ---------------------------------------------------------------------------
# Fused Pallas kernel: out = relu(img@W_img + data@W_dat + b1) @ W2 + b2
# ---------------------------------------------------------------------------
def fused_mlp(img_flat, data, w_img, w_dat, b1, w2, b2):
    B, F_img = img_flat.shape
    _, F_dat = data.shape
    Hp = w_img.shape[1]          # HIDDEN_PAD
    Op = w2.shape[1]             # OUT_PAD

    def kernel(xi_ref, xd_ref, wi_ref, wd_ref, b1_ref, w2_ref, b2_ref, o_ref):
        # First linear (concat folded into two matmuls) + bias.
        h = (jnp.dot(xi_ref[...], wi_ref[...], preferred_element_type=jnp.float32)
             + jnp.dot(xd_ref[...], wd_ref[...], preferred_element_type=jnp.float32)
             + b1_ref[...])
        # ReLU.
        h = jnp.maximum(h, 0.0)
        # Output linear + bias (lane-dense padded width).
        o_ref[...] = (jnp.dot(h, w2_ref[...], preferred_element_type=jnp.float32)
                      + b2_ref[...])

    return pl.pallas_call(
        kernel,
        out_shape=jax.ShapeDtypeStruct((B, Op), jnp.float32),
        grid=(1,),
        in_specs=[
            pl.BlockSpec((B, F_img), lambda i: (0, 0)),
            pl.BlockSpec((B, F_dat), lambda i: (0, 0)),
            pl.BlockSpec((F_img, Hp), lambda i: (0, 0)),
            pl.BlockSpec((F_dat, Hp), lambda i: (0, 0)),
            pl.BlockSpec((1, Hp), lambda i: (0, 0)),
            pl.BlockSpec((Hp, Op), lambda i: (0, 0)),
            pl.BlockSpec((1, Op), lambda i: (0, 0)),
        ],
        out_specs=pl.BlockSpec((B, Op), lambda i: (0, 0)),
        compiler_params=pltpu.CompilerParams(
            dimension_semantics=("arbitrary",),
            vmem_limit_bytes=16 * 1024 * 1024,
        ),
    )(img_flat, data, w_img, w_dat, b1, w2, b2)


# ---------------------------------------------------------------------------
# Parameters (LazyLinear sizes inferred from the example input shapes)
# ---------------------------------------------------------------------------
def init_params(key, f_img, f_dat, hidden=HIDDEN, out=OUT):
    k1, k2, k3, k4, k5 = jax.random.split(key, 5)
    return {
        # self.ll: LazyLinear(200) over cat([flatten(img), data]);
        # weight split into image / data parts (equivalent to the concat).
        "w_img": 0.02 * jax.random.normal(k1, (f_img, hidden), jnp.float32),
        "w_dat": 0.02 * jax.random.normal(k2, (f_dat, hidden), jnp.float32),
        "b1":    0.02 * jax.random.normal(k3, (1, hidden), jnp.float32),
        # self.output: LazyLinear(7)
        "w2":    0.02 * jax.random.normal(k4, (hidden, out), jnp.float32),
        "b2":    0.02 * jax.random.normal(k5, (1, out), jnp.float32),
    }


def pack_params(p, hidden_pad=HIDDEN_PAD, out_pad=OUT_PAD):
    """One-time zero-padding of weights to MXU/lane aligned shapes."""
    dh = hidden_pad - p["w_img"].shape[1]
    do = out_pad - p["w2"].shape[1]
    return {
        "w_img": jnp.pad(p["w_img"], ((0, 0), (0, dh))),
        "w_dat": jnp.pad(p["w_dat"], ((0, 0), (0, dh))),
        "b1":    jnp.pad(p["b1"],    ((0, 0), (0, dh))),
        "w2":    jnp.pad(p["w2"],    ((0, dh), (0, do))),
        "b2":    jnp.pad(p["b2"],    ((0, 0), (0, do))),
    }


@jax.jit
def forward(packed, img_nchw, data):
    # nn.Flatten on a contiguous NCHW tensor == plain reshape (no transpose).
    img_flat = img_nchw.reshape(img_nchw.shape[0], -1)
    out_padded = fused_mlp(img_flat, data,
                           packed["w_img"], packed["w_dat"], packed["b1"],
                           packed["w2"], packed["b2"])
    return out_padded[:, :OUT]


if __name__ == "__main__":
    key = jax.random.PRNGKey(0)
    k_img, k_data = jax.random.split(key)

    N, C, HH, WW = 2, 4, 16, 16        # img -> flatten to 1024 features
    D = 16                             # extra data features

    img = jax.random.normal(k_img, (N, C, HH, WW), jnp.float32)
    data = jax.random.normal(k_data, (N, D), jnp.float32)

    params = init_params(jax.random.PRNGKey(42), f_img=C * HH * WW, f_dat=D)
    packed = pack_params(params)

    out = forward(packed, img, data)
    out = jax.block_until_ready(out)

    # Pure-JAX reference of the exact PyTorch forward
    # (flatten -> cat -> Linear(200) -> ReLU -> Linear(7)).
    w1 = jnp.concatenate([params["w_img"], params["w_dat"]], axis=0)
    x_ref = jnp.concatenate([img.reshape(N, -1), data], axis=1)
    h_ref = jnp.maximum(x_ref @ w1 + params["b1"], 0.0)
    ref = h_ref @ params["w2"] + params["b2"]

    assert out.shape == (N, OUT) and out.dtype == jnp.float32
    assert jnp.allclose(out, ref, atol=1e-4, rtol=1e-4)
    print("KERNEL_OK")
</pallas_src>

<mosaic_0001>
module attributes {stable_mosaic.version = 11 : i64} {
  func.func @kernel(%arg0: i32, %arg1: memref<2x1024xf32, #tpu.memory_space<vmem>>, %arg2: memref<2x16xf32, #tpu.memory_space<vmem>>, %arg3: memref<1024x256xf32, #tpu.memory_space<vmem>>, %arg4: memref<16x256xf32, #tpu.memory_space<vmem>>, %arg5: memref<1x256xf32, #tpu.memory_space<vmem>>, %arg6: memref<256x128xf32, #tpu.memory_space<vmem>>, %arg7: memref<1x128xf32, #tpu.memory_space<vmem>>, %arg8: memref<2x128xf32, #tpu.memory_space<vmem>>) attributes {dimension_semantics = [#tpu.dimension_semantics<arbitrary>], iteration_bounds = array<i64: 1>, scalar_prefetch = 0 : i64, scratch_operands = 0 : i64, tpu.core_type = #tpu.core_type<tc>, window_params = [{pipeline_mode = #tpu.pipeline_mode<synchronous>, transform_indices = @transform_0, window_bounds = array<i64: 2, 1024>}, {pipeline_mode = #tpu.pipeline_mode<synchronous>, transform_indices = @transform_1, window_bounds = array<i64: 2, 16>}, {pipeline_mode = #tpu.pipeline_mode<synchronous>, transform_indices = @transform_2, window_bounds = array<i64: 1024, 256>}, {pipeline_mode = #tpu.pipeline_mode<synchronous>, transform_indices = @transform_3, window_bounds = array<i64: 16, 256>}, {pipeline_mode = #tpu.pipeline_mode<synchronous>, transform_indices = @transform_4, window_bounds = array<i64: 1, 256>}, {pipeline_mode = #tpu.pipeline_mode<synchronous>, transform_indices = @transform_5, window_bounds = array<i64: 256, 128>}, {pipeline_mode = #tpu.pipeline_mode<synchronous>, transform_indices = @transform_6, window_bounds = array<i64: 1, 128>}, {pipeline_mode = #tpu.pipeline_mode<synchronous>, transform_indices = @transform_7, window_bounds = array<i64: 2, 128>}]} {
    %c0 = arith.constant 0 : index
    %c0_0 = arith.constant 0 : index
    %0 = vector.load %arg1[%c0, %c0_0] : memref<2x1024xf32, #tpu.memory_space<vmem>>, vector<2x1024xf32>
    %c0_1 = arith.constant 0 : index
    %c0_2 = arith.constant 0 : index
    %1 = vector.load %arg3[%c0_1, %c0_2] : memref<1024x256xf32, #tpu.memory_space<vmem>>, vector<1024x256xf32>
    %cst = arith.constant dense<0.000000e+00> : vector<2x256xf32>
    %2 = tpu.matmul %0, %1, %cst {dimension_numbers = #tpu.dot_dimension_numbers<[1], [0], [0], [1], [0, 0, 1, 1], [], []>} : vector<2x1024xf32>, vector<1024x256xf32>, vector<2x256xf32> -> vector<2x256xf32>
    %c0_3 = arith.constant 0 : index
    %c0_4 = arith.constant 0 : index
    %3 = vector.load %arg2[%c0_3, %c0_4] : memref<2x16xf32, #tpu.memory_space<vmem>>, vector<2x16xf32>
    %c0_5 = arith.constant 0 : index
    %c0_6 = arith.constant 0 : index
    %4 = vector.load %arg4[%c0_5, %c0_6] : memref<16x256xf32, #tpu.memory_space<vmem>>, vector<16x256xf32>
    %cst_7 = arith.constant dense<0.000000e+00> : vector<2x256xf32>
    %5 = tpu.matmul %3, %4, %cst_7 {dimension_numbers = #tpu.dot_dimension_numbers<[1], [0], [0], [1], [0, 0, 1, 1], [], []>} : vector<2x16xf32>, vector<16x256xf32>, vector<2x256xf32> -> vector<2x256xf32>
    %6 = arith.addf %2, %5 : vector<2x256xf32>
    %c0_8 = arith.constant 0 : index
    %c0_9 = arith.constant 0 : index
    %7 = vector.load %arg5[%c0_8, %c0_9] : memref<1x256xf32, #tpu.memory_space<vmem>>, vector<1x256xf32>
    %8 = vector.broadcast %7 : vector<1x256xf32> to vector<2x256xf32>
    %9 = arith.addf %6, %8 : vector<2x256xf32>
    %cst_10 = arith.constant 0.000000e+00 : f32
    %10 = vector.broadcast %cst_10 : f32 to vector<2x256xf32>
    %11 = arith.maximumf %9, %10 : vector<2x256xf32>
    %c0_11 = arith.constant 0 : index
    %c0_12 = arith.constant 0 : index
    %12 = vector.load %arg6[%c0_11, %c0_12] : memref<256x128xf32, #tpu.memory_space<vmem>>, vector<256x128xf32>
    %cst_13 = arith.constant dense<0.000000e+00> : vector<2x128xf32>
    %13 = tpu.matmul %11, %12, %cst_13 {dimension_numbers = #tpu.dot_dimension_numbers<[1], [0], [0], [1], [0, 0, 1, 1], [], []>} : vector<2x256xf32>, vector<256x128xf32>, vector<2x128xf32> -> vector<2x128xf32>
    %c0_14 = arith.constant 0 : index
    %c0_15 = arith.constant 0 : index
    %14 = vector.load %arg7[%c0_14, %c0_15] : memref<1x128xf32, #tpu.memory_space<vmem>>, vector<1x128xf32>
    %15 = vector.broadcast %14 : vector<1x128xf32> to vector<2x128xf32>
    %16 = arith.addf %13, %15 : vector<2x128xf32>
    %c0_16 = arith.constant 0 : index
    %c0_17 = arith.constant 0 : index
    %17 = vector.load %arg8[%c0_16, %c0_17] : memref<2x128xf32, #tpu.memory_space<vmem>>, vector<2x128xf32>
    tpu.vector_store %arg8[%c0_16, %c0_17], %16 {strides = array<i32>} : memref<2x128xf32, #tpu.memory_space<vmem>>, vector<2x128xf32>,
    return
  }
  func.func @transform_0(%arg0: i32) -> (i32, i32) {
    %c0_i32 = arith.constant 0 : i32
    %c0_i32_0 = arith.constant 0 : i32
    %c0_i32_1 = arith.constant 0 : i32
    return %c0_i32, %c0_i32_0 : i32, i32
  }
  func.func @transform_1(%arg0: i32) -> (i32, i32) {
    %c0_i32 = arith.constant 0 : i32
    %c0_i32_0 = arith.constant 0 : i32
    %c0_i32_1 = arith.constant 0 : i32
    return %c0_i32, %c0_i32_0 : i32, i32
  }
  func.func @transform_2(%arg0: i32) -> (i32, i32) {
    %c0_i32 = arith.constant 0 : i32
    %c0_i32_0 = arith.constant 0 : i32
    %c0_i32_1 = arith.constant 0 : i32
    return %c0_i32, %c0_i32_0 : i32, i32
  }
  func.func @transform_3(%arg0: i32) -> (i32, i32) {
    %c0_i32 = arith.constant 0 : i32
    %c0_i32_0 = arith.constant 0 : i32
    %c0_i32_1 = arith.constant 0 : i32
    return %c0_i32, %c0_i32_0 : i32, i32
  }
  func.func @transform_4(%arg0: i32) -> (i32, i32) {
    %c0_i32 = arith.constant 0 : i32
    %c0_i32_0 = arith.constant 0 : i32
    %c0_i32_1 = arith.constant 0 : i32
    return %c0_i32, %c0_i32_0 : i32, i32
  }
  func.func @transform_5(%arg0: i32) -> (i32, i32) {
    %c0_i32 = arith.constant 0 : i32
    %c0_i32_0 = arith.constant 0 : i32
    %c0_i32_1 = arith.constant 0 : i32
    return %c0_i32, %c0_i32_0 : i32, i32
  }
  func.func @transform_6(%arg0: i32) -> (i32, i32) {
    %c0_i32 = arith.constant 0 : i32
    %c0_i32_0 = arith.constant 0 : i32
    %c0_i32_1 = arith.constant 0 : i32
    return %c0_i32, %c0_i32_0 : i32, i32
  }
  func.func @transform_7(%arg0: i32) -> (i32, i32) {
    %c0_i32 = arith.constant 0 : i32
    %c0_i32_0 = arith.constant 0 : i32
    %c0_i32_1 = arith.constant 0 : i32
    return %c0_i32, %c0_i32_0 : i32, i32
  }
}

</mosaic_0001>

<bundles_post_ra>
// kernel: forward.1
= control target key start
LH: loop header
LB: loop body
LE: loop exit
PB: predicated region body
PF: predicated region fallthrough
CT: control target
= control target key end

     0   :  { %12 = vsyncpa [#allocation3], 0  ;;  %s1437_s0 = inlined_call_operand.vmem [shape: f32[2,1024], index: 0, kind: input, shape index: {}]   ;;  %s1438_s1 = inlined_call_operand.vmem [shape: f32[2,16], index: 1, kind: input, shape index: {}]   ;;  %s1439_s2 = inlined_call_operand.hbm [shape: f32[1024,256], index: 2, kind: input, shape index: {}]   ;;  %s1440_s3 = inlined_call_operand.vmem [shape: f32[16,256], index: 3, kind: input, shape index: {}]   ;;  %s1441_s4 = inlined_call_operand.vmem [shape: f32[1,256], index: 4, kind: input, shape index: {}]   ;;  %s1442_s5 = inlined_call_operand.hbm [shape: f32[256,128], index: 5, kind: input, shape index: {}]   ;;  %s1443_s6 = inlined_call_operand.vmem [shape: f32[1,128], index: 6, kind: input, shape index: {}]   ;;  %s1444_s7 = inlined_call_operand.hbm [shape: f32[2,128], index: 7, kind: output, shape index: {}]  }
   0x1   :  { %13 = vsyncpa [#allocation6], 0 }
   0x2   :  { %14 = vsyncpa [#allocation4], 0  ;;  %s1283_s24 = smov [#allocation2]   ;;  %s1211_s28 = scalar_lea.hbm %s1439_s2, 32768 }
   0x3   :  { %s24_s25 = sshll.u32 %s1283_s24, 4  ;;  %p1212_p0 = scmp.ne.s32.totalorder %s1439_s2, %s1211_s28  ;;  %s25_s25 = int_to_ptr.vmem [resolvable:$true] %s24_s25 }
   0x4   :  { %p1215_p1 = scmp.lt.u32.totalorder %s1211_s28, %s1439_s2 }
   0x6   :  { %p1217_p2 = pnand %p1215_p1, %p1212_p0 }
   0x8   :  { %1220 = shalt.err (!%p1217_p2)
}
   0x9   :  { %s1221_s10 = scalar_lea.vmem %s25_s25, 32768  ;;  %p1226_p4 = scmp.lt.s32.totalorder %s25_s25, %s25_s25 }
   0xa   :  { %p1222_p3 = scmp.ne.s32.totalorder %s25_s25, %s1221_s10  ;;  %p1227_p5 = scmp.lt.s32.totalorder %s1221_s10, %s1221_s10 }
   0xc   :  { %p1228_p6 = por %p1227_p5, %p1226_p4 }
   0xe   :  { %p1229_p7 = pnand %p1228_p6, %p1222_p3 }
  0x10   :  { %1232 = shalt.err (!%p1229_p7)
}
  0x11   :  { %s1284_s11 = smov 256   ;;  %s1285_s12 = smov 16  }
  0x12   :  { %30 = dma.hbm_to_vmem [thread:$0]  %s1439_s2, 32768, %s25_s25, [#allocation3], %s1284_s11, %s1284_s11, %s1285_s12  }
  0x13   :  { %s1286_s15 = smov [#allocation5]   ;;  %s1233_s19 = scalar_lea.hbm %s1442_s5, 4096 }
  0x14   :  { %s40_s16 = sshll.u32 %s1286_s15, 4  ;;  %p1234_p8 = scmp.ne.s32.totalorder %s1442_s5, %s1233_s19  ;;  %s41_s16 = int_to_ptr.vmem [resolvable:$true] %s40_s16 }
  0x15   :  { %p1237_p9 = scmp.lt.u32.totalorder %s1233_s19, %s1442_s5 }
  0x17   :  { %p1239_p10 = pnand %p1237_p9, %p1234_p8 }
  0x19   :  { %1242 = shalt.err (!%p1239_p10)
}
  0x1a   :  { %s1243_s24 = scalar_lea.vmem %s41_s16, 4096  ;;  %p1248_p12 = scmp.lt.s32.totalorder %s41_s16, %s41_s16 }
  0x1b   :  { %p1244_p11 = scmp.ne.s32.totalorder %s41_s16, %s1243_s24  ;;  %p1249_p13 = scmp.lt.s32.totalorder %s1243_s24, %s1243_s24 }
  0x1d   :  { %p1250_p0 = por %p1249_p13, %p1248_p12 }
  0x1f   :  { %p1251_p1 = pnand %p1250_p0, %p1244_p11 }
  0x21   :  { %1254 = shalt.err (!%p1251_p1)
}
  0x22   :  { %s1287_s2 = smov 128   ;;  %s1288_s25 = smov 8  }
  0x23   :  { %46 = dma.hbm_to_vmem [thread:$0]  %s1442_s5, 4096, %s41_s16, [#allocation6], %s1287_s2, %s1287_s2, %s1288_s25  }
  0x24   :  { %1277 = dma.done.wait [#allocation3], 32768  }
  0x25   :  { %1278 = vsyncadd [#allocation3], 4294934528 }
  0x26   :  { %1279 = dma.done.wait [#allocation6], 4096  }
  0x27   :  { %1280 = vsyncadd [#allocation6], 4294963200  ;;  %v1289_v0 = vmov 0.0   ;;  %v315_v1 = vld [vmem:[%s1440_s3 + $0x8] sm:$0xff]  ;;  %v317_v2 = vld [vmem:[%s1440_s3 + $0x18] sm:$0xff]  ;;  %vm318_vm0 = vcmask 130048  }
  0x28   :  { %386 = vmatprep.mubr.f32.mxu0 %v1289_v0  ;;  %v58_v3 = vld [vmem:[#allocation2 + $0x8] sm:$0xff]  ;;  %v900_v4 = vpack.c.bf16 %v317_v2, %v315_v1  ;;  %v60_v5 = vld [vmem:[#allocation2 + $0x18] sm:$0xff]  ;;  %v314_v6 = vld [vmem:[%s1440_s3] sm:$0xff]  ;;  %s1291_s18 = smov [#allocation7]  }
  0x29   :  { %v316_v7 = vld [vmem:[%s1440_s3 + $0x10] sm:$0xff]  ;;  %v904_v8 = vpack.c.bf16 %v60_v5, %v58_v3  ;;  %v57_v10 = vld [vmem:[#allocation2] sm:$0xff]  ;;  %v62_v14 = vld [vmem:[#allocation2 + $0x28] sm:$0xff]  ;;  %s853_s19 = sshll.u32 %s1291_s18, 4  ;;  %s854_s19 = int_to_ptr.vmem [resolvable:$true] %s853_s19 }
  0x2a   :  { %v902_v9 = vpack.c.bf16 %v316_v7, %v314_v6  ;;  %v59_v11 = vld [vmem:[#allocation2 + $0x10] sm:$0xff]  ;;  %v313_v12 = vld [vmem:[%s1438_s1] sm:$0x3]  ;;  %901 = vmatprep.subr.bf16.mxu0 %v900_v4  ;;  %v64_v15 = vld [vmem:[#allocation2 + $0x38] sm:$0xff]  ;;  %s1255_s20 = scalar_lea.vmem %s854_s19, 32  ;;  %p1260_p3 = scmp.lt.s32.totalorder %s854_s19, %s854_s19 }
  0x2b   :  { %v906_v13 = vpack.c.bf16 %v59_v11, %v57_v10  ;;  %v186_v16 = vld [vmem:[#allocation2 + $0x408] sm:$0xff]  ;;  %905 = vmatprep.subr.bf16.mxu1 %v904_v8  ;;  %v908_v17 = vpack.c.bf16 %v64_v15, %v62_v14  ;;  %v188_v18 = vld [vmem:[#allocation2 + $0x418] sm:$0xff]  ;;  %v61_v19 = vld [vmem:[#allocation2 + $0x20] sm:$0xff]  ;;  %p1256_p2 = scmp.ne.s32.totalorder %s854_s19, %s1255_s20  ;;  %p1261_p4 = scmp.lt.s32.totalorder %s1255_s20, %s1255_s20 }
  0x2c   :  { %903 = vmatpush1.bf16.msra.mxu0 %v902_v9  ;;  %v63_v20 = vld [vmem:[#allocation2 + $0x30] sm:$0xff]  ;;  %v1032_v21 = vpack.c.bf16 %v188_v18, %v186_v16  ;;  %v185_v23 = vld [vmem:[#allocation2 + $0x400] sm:$0xff]  ;;  %v66_v25 = vld [vmem:[#allocation2 + $0x48] sm:$0xff] }
  0x2d   :  { %907 = vmatpush1.bf16.msra.mxu1 %v906_v13  ;;  %v910_v22 = vpack.c.bf16 %v63_v20, %v61_v19  ;;  %v187_v24 = vld [vmem:[#allocation2 + $0x410] sm:$0xff]  ;;  %v68_v27 = vld [vmem:[#allocation2 + $0x58] sm:$0xff]  ;;  %v190_v28 = vld [vmem:[#allocation2 + $0x428] sm:$0xff]  ;;  %p1262_p5 = por %p1261_p4, %p1260_p3 }
  0x2e   :  { %909 = vmatprep.subr.bf16.mxu1 %v908_v17  ;;  %v1034_v26 = vpack.c.bf16 %v187_v24, %v185_v23  ;;  %v192_v29 = vld [vmem:[#allocation2 + $0x438] sm:$0xff]  ;;  %1033 = vmatprep.subr.bf16.mxu0 %v1032_v21  ;;  %v912_v30 = vpack.c.bf16 %v68_v27, %v66_v25  ;;  %v65_v32 = vld [vmem:[#allocation2 + $0x40] sm:$0xff]  ;;  %v67_v33 = vld [vmem:[#allocation2 + $0x50] sm:$0xff] }
  0x2f   :  { %863 = vmatmul.mubr.msk.f32.vlgmr.msra.gmra.mrb[0].mxu0 %vm318_vm0, %v313_v12  ;;  %v1036_v31 = vpack.c.bf16 %v192_v29, %v190_v28  ;;  %v189_v34 = vld [vmem:[#allocation2 + $0x420] sm:$0xff]  ;;  %v191_v35 = vld [vmem:[#allocation2 + $0x430] sm:$0xff]  ;;  %v70_v36 = vld [vmem:[#allocation2 + $0x68] sm:$0xff]  ;;  %v914_v38 = vpack.c.bf16 %v67_v33, %v65_v32  ;;  %p1263_p6 = pnand %p1262_p5, %p1256_p2 }
  0x30   :  { %1035 = vmatpush1.bf16.msra.mxu0 %v1034_v26  ;;  %v72_v37 = vld [vmem:[#allocation2 + $0x78] sm:$0xff]  ;;  %v1038_v39 = vpack.c.bf16 %v191_v35, %v189_v34  ;;  %v194_v40 = vld [vmem:[#allocation2 + $0x448] sm:$0xff]  ;;  %v69_v42 = vld [vmem:[#allocation2 + $0x60] sm:$0xff] }
  0x31   :  { %911 = vmatpush1.bf16.msra.mxu1 %v910_v22  ;;  %1037 = vmatprep.subr.bf16.mxu0 %v1036_v31  ;;  %v196_v41 = vld [vmem:[#allocation2 + $0x458] sm:$0xff]  ;;  %v916_v43 = vpack.c.bf16 %v72_v37, %v70_v36  ;;  %v71_v45 = vld [vmem:[#allocation2 + $0x70] sm:$0xff]  ;;  %v193_v46 = vld [vmem:[#allocation2 + $0x440] sm:$0xff] }
  0x32   :  { %913 = vmatprep.subr.bf16.mxu1 %v912_v30  ;;  %v1040_v44 = vpack.c.bf16 %v196_v41, %v194_v40  ;;  %v195_v47 = vld [vmem:[#allocation2 + $0x450] sm:$0xff]  ;;  %v74_v48 = vld [vmem:[#allocation2 + $0x88] sm:$0xff]  ;;  %v76_v49 = vld [vmem:[#allocation2 + $0x98] sm:$0xff]  ;;  %v918_v53 = vpack.c.bf16 %v71_v45, %v69_v42 }
  0x33   :  { %v198_v50 = vld [vmem:[#allocation2 + $0x468] sm:$0xff]  ;;  %v1042_v51 = vpack.c.bf16 %v195_v47, %v193_v46  ;;  %v200_v52 = vld [vmem:[#allocation2 + $0x478] sm:$0xff]  ;;  %v73_v55 = vld [vmem:[#allocation2 + $0x80] sm:$0xff]  ;;  %v920_v58 = vpack.c.bf16 %v76_v49, %v74_v48  ;;  %v1290_v49 = vmov 1983009808  }
  0x34   :  { %1039 = vmatpush1.bf16.msra.mxu0 %v1038_v39  ;;  %v1044_v54 = vpack.c.bf16 %v200_v52, %v198_v50  ;;  %v197_v56 = vld [vmem:[#allocation2 + $0x460] sm:$0xff]  ;;  %v199_v57 = vld [vmem:[#allocation2 + $0x470] sm:$0xff]  ;;  %v202_v60 = vld [vmem:[#allocation2 + $0x488] sm:$0xff]  ;;  %v397_v50 = vunpack.c.l.s4 %v1290_v49 }
  0x35   :  { %915 = vmatpush1.bf16.msra.mxu1 %v914_v38  ;;  %1041 = vmatprep.subr.bf16.mxu0 %v1040_v44  ;;  %v75_v59 = vld [vmem:[#allocation2 + $0x90] sm:$0xff]  ;;  %v204_v61 = vld [vmem:[#allocation2 + $0x498] sm:$0xff]  ;;  %v78_v62 = vld [vmem:[#allocation2 + $0xa8] sm:$0xff]  ;;  %v1046_v0 = vpack.c.bf16 %v199_v57, %v197_v56 }
  0x36   :  { %917 = vmatprep.subr.bf16.mxu1 %v916_v43  ;;  %v80_v63 = vld [vmem:[#allocation2 + $0xb8] sm:$0xff]  ;;  %v922_v1 = vpack.c.bf16 %v75_v59, %v73_v55  ;;  %v1048_v2 = vpack.c.bf16 %v204_v61, %v202_v60  ;;  %v77_v3 = vld [vmem:[#allocation2 + $0xa0] sm:$0xff]  ;;  %v203_v5 = vld [vmem:[#allocation2 + $0x490] sm:$0xff] }
  0x37   :  { %v201_v4 = vld [vmem:[#allocation2 + $0x480] sm:$0xff]  ;;  %v924_v6 = vpack.c.bf16 %v80_v63, %v78_v62  ;;  %v79_v7 = vld [vmem:[#allocation2 + $0xb0] sm:$0xff]  ;;  %v206_v8 = vld [vmem:[#allocation2 + $0x4a8] sm:$0xff] }
  0x38   :  { %1043 = vmatpush1.bf16.msra.mxu0 %v1042_v51  ;;  %v208_v9 = vld [vmem:[#allocation2 + $0x4b8] sm:$0xff]  ;;  %v82_v10 = vld [vmem:[#allocation2 + $0xc8] sm:$0xff]  ;;  %v1050_v12 = vpack.c.bf16 %v203_v5, %v201_v4  ;;  %v926_v13 = vpack.c.bf16 %v79_v7, %v77_v3  ;;  %v81_v15 = vld [vmem:[#allocation2 + $0xc0] sm:$0xff]  ;;  %v399_v51 = vlaneseq }
  0x39   :  { %919 = vmatpush1.bf16.msra.mxu1 %v918_v53  ;;  %1045 = vmatprep.subr.bf16.mxu0 %v1044_v54  ;;  %v84_v11 = vld [vmem:[#allocation2 + $0xd8] sm:$0xff]  ;;  %v1052_v14 = vpack.c.bf16 %v208_v9, %v206_v8  ;;  %v205_v16 = vld [vmem:[#allocation2 + $0x4a0] sm:$0xff]  ;;  %v207_v17 = vld [vmem:[#allocation2 + $0x4b0] sm:$0xff] }
  0x3a   :  { %921 = vmatprep.subr.bf16.mxu1 %v920_v58  ;;  %v928_v18 = vpack.c.bf16 %v84_v11, %v82_v10  ;;  %v83_v19 = vld [vmem:[#allocation2 + $0xd0] sm:$0xff]  ;;  %v210_v20 = vld [vmem:[#allocation2 + $0x4c8] sm:$0xff]  ;;  %v212_v21 = vld [vmem:[#allocation2 + $0x4d8] sm:$0xff]  ;;  %v1054_v24 = vpack.c.bf16 %v207_v17, %v205_v16 }
  0x3b   :  { %v86_v22 = vld [vmem:[#allocation2 + $0xe8] sm:$0xff]  ;;  %v88_v23 = vld [vmem:[#allocation2 + $0xf8] sm:$0xff]  ;;  %v930_v25 = vpack.c.bf16 %v83_v19, %v81_v15  ;;  %v1056_v26 = vpack.c.bf16 %v212_v21, %v210_v20  ;;  %v85_v27 = vld [vmem:[#allocation2 + $0xe0] sm:$0xff] }
  0x3c   :  { %1047 = vmatpush1.bf16.msra.mxu0 %v1046_v0  ;;  %v209_v28 = vld [vmem:[#allocation2 + $0x4c0] sm:$0xff]  ;;  %v211_v29 = vld [vmem:[#allocation2 + $0x4d0] sm:$0xff]  ;;  %v932_v30 = vpack.c.bf16 %v88_v23, %v86_v22  ;;  %v214_v32 = vld [vmem:[#allocation2 + $0x4e8] sm:$0xff]  ;;  %v398_v0 = vunpack.c.0.s8 %v397_v50 }
  0x3d   :  { %923 = vmatpush1.bf16.msra.mxu1 %v922_v1  ;;  %1049 = vmatprep.subr.bf16.mxu0 %v1048_v2  ;;  %v87_v31 = vld [vmem:[#allocation2 + $0xf0] sm:$0xff]  ;;  %v216_v33 = vld [vmem:[#allocation2 + $0x4f8] sm:$0xff]  ;;  %v90_v34 = vld [vmem:[#allocation2 + $0x108] sm:$0xff]  ;;  %v1058_v36 = vpack.c.bf16 %v211_v29, %v209_v28  ;;  %v1372_v1 = vshrl.u32 %v399_v51, 7 }
  0x3e   :  { %925 = vmatprep.subr.bf16.mxu1 %v924_v6  ;;  %v92_v35 = vld [vmem:[#allocation2 + $0x118] sm:$0xff]  ;;  %v934_v37 = vpack.c.bf16 %v87_v31, %v85_v27  ;;  %v1060_v38 = vpack.c.bf16 %v216_v33, %v214_v32  ;;  %v89_v39 = vld [vmem:[#allocation2 + $0x100] sm:$0xff]  ;;  %v215_v41 = vld [vmem:[#allocation2 + $0x4f0] sm:$0xff] }
  0x3f   :  { %v213_v40 = vld [vmem:[#allocation2 + $0x4e0] sm:$0xff]  ;;  %v936_v42 = vpack.c.bf16 %v92_v35, %v90_v34  ;;  %v91_v43 = vld [vmem:[#allocation2 + $0x110] sm:$0xff]  ;;  %v218_v44 = vld [vmem:[#allocation2 + $0x508] sm:$0xff] }
  0x40   :  { %1051 = vmatpush1.bf16.msra.mxu0 %v1050_v12  ;;  %v220_v45 = vld [vmem:[#allocation2 + $0x518] sm:$0xff]  ;;  %v94_v46 = vld [vmem:[#allocation2 + $0x128] sm:$0xff]  ;;  %v1062_v48 = vpack.c.bf16 %v215_v41, %v213_v40  ;;  %v938_v52 = vpack.c.bf16 %v91_v43, %v89_v39  ;;  %v93_v54 = vld [vmem:[#allocation2 + $0x120] sm:$0xff] }
  0x41   :  { %927 = vmatpush1.bf16.msra.mxu1 %v926_v13  ;;  %1053 = vmatprep.subr.bf16.mxu0 %v1052_v14  ;;  %v96_v47 = vld [vmem:[#allocation2 + $0x138] sm:$0xff]  ;;  %v1064_v53 = vpack.c.bf16 %v220_v45, %v218_v44  ;;  %v217_v55 = vld [vmem:[#allocation2 + $0x500] sm:$0xff]  ;;  %v219_v56 = vld [vmem:[#allocation2 + $0x510] sm:$0xff]  ;;  %v1375_v14 = vsub.s32 %v398_v0, %v1372_v1 }
  0x42   :  { %929 = vmatprep.subr.bf16.mxu1 %v928_v18  ;;  %v940_v57 = vpack.c.bf16 %v96_v47, %v94_v46  ;;  %v95_v58 = vld [vmem:[#allocation2 + $0x130] sm:$0xff]  ;;  %v222_v59 = vld [vmem:[#allocation2 + $0x528] sm:$0xff]  ;;  %v224_v60 = vld [vmem:[#allocation2 + $0x538] sm:$0xff]  ;;  %v1066_v63 = vpack.c.bf16 %v219_v56, %v217_v55 }
  0x43   :  { %v98_v61 = vld [vmem:[#allocation2 + $0x148] sm:$0xff]  ;;  %v100_v62 = vld [vmem:[#allocation2 + $0x158] sm:$0xff]  ;;  %v942_v2 = vpack.c.bf16 %v95_v58, %v93_v54  ;;  %v1068_v3 = vpack.c.bf16 %v224_v60, %v222_v59  ;;  %v97_v4 = vld [vmem:[#allocation2 + $0x140] sm:$0xff] }
  0x44   :  { %1055 = vmatpush1.bf16.msra.mxu0 %v1054_v24  ;;  %v221_v5 = vld [vmem:[#allocation2 + $0x520] sm:$0xff]  ;;  %v223_v6 = vld [vmem:[#allocation2 + $0x530] sm:$0xff]  ;;  %v944_v7 = vpack.c.bf16 %v100_v62, %v98_v61  ;;  %v226_v9 = vld [vmem:[#allocation2 + $0x548] sm:$0xff] }
  0x45   :  { %931 = vmatpush1.bf16.msra.mxu1 %v930_v25  ;;  %1057 = vmatprep.subr.bf16.mxu0 %v1056_v26  ;;  %v99_v8 = vld [vmem:[#allocation2 + $0x150] sm:$0xff]  ;;  %v228_v10 = vld [vmem:[#allocation2 + $0x558] sm:$0xff]  ;;  %v102_v11 = vld [vmem:[#allocation2 + $0x168] sm:$0xff]  ;;  %v1070_v13 = vpack.c.bf16 %v223_v6, %v221_v5 }
  0x46   :  { %933 = vmatprep.subr.bf16.mxu1 %v932_v30  ;;  %v104_v12 = vld [vmem:[#allocation2 + $0x178] sm:$0xff]  ;;  %v946_v15 = vpack.c.bf16 %v99_v8, %v97_v4  ;;  %v1072_v16 = vpack.c.bf16 %v228_v10, %v226_v9  ;;  %v101_v17 = vld [vmem:[#allocation2 + $0x160] sm:$0xff]  ;;  %v227_v19 = vld [vmem:[#allocation2 + $0x550] sm:$0xff] }
  0x47   :  { %v225_v18 = vld [vmem:[#allocation2 + $0x540] sm:$0xff]  ;;  %v948_v20 = vpack.c.bf16 %v104_v12, %v102_v11  ;;  %v103_v21 = vld [vmem:[#allocation2 + $0x170] sm:$0xff]  ;;  %v230_v22 = vld [vmem:[#allocation2 + $0x568] sm:$0xff] }
  0x48   :  { %1059 = vmatpush1.bf16.msra.mxu0 %v1058_v36  ;;  %v232_v23 = vld [vmem:[#allocation2 + $0x578] sm:$0xff]  ;;  %v106_v24 = vld [vmem:[#allocation2 + $0x188] sm:$0xff]  ;;  %v1380_v26 = vld [vmem:[%s1437_s0] sm:$0xff]  ;;  %v1074_v27 = vpack.c.bf16 %v227_v19, %v225_v18  ;;  %v950_v30 = vpack.c.bf16 %v103_v21, %v101_v17 }
  0x49   :  { %935 = vmatpush1.bf16.msra.mxu1 %v934_v37  ;;  %1061 = vmatprep.subr.bf16.mxu0 %v1060_v38  ;;  %v108_v25 = vld [vmem:[#allocation2 + $0x198] sm:$0xff]  ;;  %v105_v28 = vld [vmem:[#allocation2 + $0x180] sm:$0xff]  ;;  %v1384_v29 = vrot.slane %v1380_v26, %v1375_v14  ;;  %v1076_v31 = vpack.c.bf16 %v232_v23, %v230_v22  ;;  %v107_v32 = vld [vmem:[#allocation2 + $0x190] sm:$0xff] }
  0x4a   :  { %937 = vmatprep.subr.bf16.mxu1 %v936_v42  ;;  %v229_v33 = vld [vmem:[#allocation2 + $0x560] sm:$0xff]  ;;  %v231_v34 = vld [vmem:[#allocation2 + $0x570] sm:$0xff]  ;;  %v952_v35 = vpack.c.bf16 %v108_v25, %v106_v24  ;;  %v234_v36 = vld [vmem:[#allocation2 + $0x588] sm:$0xff]  ;;  %v954_v44 = vpack.c.bf16 %v107_v32, %v105_v28 }
  0x4b   :  { %v236_v37 = vld [vmem:[#allocation2 + $0x598] sm:$0xff]  ;;  %v410_v38 = vcombine.high %v1384_v29, %v1384_v29  ;;  %v1391_v39 = vld [vmem:[%s1437_s0 + $0x8] sm:$0xff]  ;;  %v1078_v43 = vpack.c.bf16 %v231_v34, %v229_v33  ;;  %v109_v46 = vld [vmem:[#allocation2 + $0x1a0] sm:$0xff] }
  0x4c   :  { %1063 = vmatpush1.bf16.msra.mxu0 %v1062_v48  ;;  %v110_v40 = vld [vmem:[#allocation2 + $0x1a8] sm:$0xff]  ;;  %v112_v41 = vld [vmem:[#allocation2 + $0x1b8] sm:$0xff]  ;;  %v1395_v42 = vrot.slane %v1391_v39, %v1375_v14  ;;  %v1080_v45 = vpack.c.bf16 %v236_v37, %v234_v36  ;;  %v233_v47 = vld [vmem:[#allocation2 + $0x580] sm:$0xff] }
  0x4d   :  { %939 = vmatpush1.bf16.msra.mxu1 %v938_v52  ;;  %1065 = vmatprep.subr.bf16.mxu0 %v1064_v53  ;;  %v235_v48 = vld [vmem:[#allocation2 + $0x590] sm:$0xff]  ;;  %v956_v50 = vpack.c.bf16 %v112_v41, %v110_v40  ;;  %v238_v52 = vld [vmem:[#allocation2 + $0x5a8] sm:$0xff]  ;;  %v240_v53 = vld [vmem:[#allocation2 + $0x5b8] sm:$0xff] }
  0x4e   :  { %941 = vmatprep.subr.bf16.mxu1 %v940_v57  ;;  %501 = vmatprep.mubr.f32.mxu1 %v410_v38  ;;  %v427_v49 = vcombine.high %v1395_v42, %v1395_v42  ;;  %v111_v51 = vld [vmem:[#allocation2 + $0x1b0] sm:$0xff]  ;;  %v114_v54 = vld [vmem:[#allocation2 + $0x1c8] sm:$0xff]  ;;  %v116_v55 = vld [vmem:[#allocation2 + $0x1d8] sm:$0xff]  ;;  %v1082_v56 = vpack.c.bf16 %v235_v48, %v233_v47  ;;  %v1084_v58 = vpack.c.bf16 %v240_v53, %v238_v52 }
  0x4f   :  { %v958_v57 = vpack.c.bf16 %v111_v51, %v109_v46  ;;  %v113_v59 = vld [vmem:[#allocation2 + $0x1c0] sm:$0xff]  ;;  %v239_v61 = vld [vmem:[#allocation2 + $0x5b0] sm:$0xff]  ;;  %v960_v62 = vpack.c.bf16 %v116_v55, %v114_v54  ;;  %v242_v0 = vld [vmem:[#allocation2 + $0x5c8] sm:$0xff] }
  0x50   :  { %1067 = vmatpush1.bf16.msra.mxu0 %v1066_v63  ;;  %643 = vmatprep.mubr.f32.mxu0 %v427_v49  ;;  %v237_v60 = vld [vmem:[#allocation2 + $0x5a0] sm:$0xff]  ;;  %v115_v63 = vld [vmem:[#allocation2 + $0x1d0] sm:$0xff]  ;;  %v120_v4 = vld [vmem:[#allocation2 + $0x1f8] sm:$0xff] }
  0x51   :  { %943 = vmatpush1.bf16.msra.mxu1 %v942_v2  ;;  %1069 = vmatprep.subr.bf16.mxu0 %v1068_v3  ;;  %v244_v2 = vld [vmem:[#allocation2 + $0x5d8] sm:$0xff]  ;;  %v118_v3 = vld [vmem:[#allocation2 + $0x1e8] sm:$0xff]  ;;  %v1086_v5 = vpack.c.bf16 %v239_v61, %v237_v60  ;;  %v962_v6 = vpack.c.bf16 %v115_v63, %v113_v59  ;;  %v117_v8 = vld [vmem:[#allocation2 + $0x1e0] sm:$0xff] }
  0x52   :  { %945 = vmatprep.subr.bf16.mxu1 %v944_v7  ;;  %v1088_v7 = vpack.c.bf16 %v244_v2, %v242_v0  ;;  %v241_v9 = vld [vmem:[#allocation2 + $0x5c0] sm:$0xff]  ;;  %v243_v10 = vld [vmem:[#allocation2 + $0x5d0] sm:$0xff]  ;;  %v964_v11 = vpack.c.bf16 %v120_v4, %v118_v3  ;;  %v122_v17 = vld [vmem:[#allocation2 + $0x208] sm:$0xff] }
  0x53   :  { %v119_v12 = vld [vmem:[#allocation2 + $0x1f0] sm:$0xff]  ;;  %v124_v18 = vld [vmem:[#allocation2 + $0x218] sm:$0xff]  ;;  %v1090_v19 = vpack.c.bf16 %v243_v10, %v241_v9  ;;  %v121_v23 = vld [vmem:[#allocation2 + $0x200] sm:$0xff] }
  0x54   :  { %1071 = vmatpush1.bf16.msra.mxu0 %v1070_v13  ;;  %v395_v13 = vcombine.high %v1380_v26, %v1380_v26  ;;  %v966_v21 = vpack.c.bf16 %v119_v12, %v117_v8  ;;  %v245_v24 = vld [vmem:[#allocation2 + $0x5e0] sm:$0xff]  ;;  %v247_v25 = vld [vmem:[#allocation2 + $0x5f0] sm:$0xff]  ;;  %v250_v26 = vld [vmem:[#allocation2 + $0x608] sm:$0xff] }
  0x55   :  { %947 = vmatpush1.bf16.msra.mxu1 %v946_v15  ;;  %1073 = vmatprep.subr.bf16.mxu0 %v1072_v16  ;;  %v246_v15 = vld [vmem:[#allocation2 + $0x5e8] sm:$0xff]  ;;  %v248_v16 = vld [vmem:[#allocation2 + $0x5f8] sm:$0xff]  ;;  %v123_v28 = vld [vmem:[#allocation2 + $0x210] sm:$0xff]  ;;  %v1094_v34 = vpack.c.bf16 %v247_v25, %v245_v24 }
  0x56   :  { %949 = vmatprep.subr.bf16.mxu1 %v948_v20  ;;  %v412_v20 = vcombine.high %v1391_v39, %v1391_v39  ;;  %v1092_v22 = vpack.c.bf16 %v248_v16, %v246_v15  ;;  %v126_v32 = vld [vmem:[#allocation2 + $0x228] sm:$0xff]  ;;  %v128_v33 = vld [vmem:[#allocation2 + $0x238] sm:$0xff]  ;;  %v970_v36 = vpack.c.bf16 %v123_v28, %v121_v23  ;;  %v125_v38 = vld [vmem:[#allocation2 + $0x220] sm:$0xff] }
  0x57   :  { %v249_v39 = vld [vmem:[#allocation2 + $0x600] sm:$0xff]  ;;  %v251_v40 = vld [vmem:[#allocation2 + $0x610] sm:$0xff]  ;;  %v972_v41 = vpack.c.bf16 %v128_v33, %v126_v32  ;;  %v130_v47 = vld [vmem:[#allocation2 + $0x248] sm:$0xff] }
  0x58   :  { %1075 = vmatpush1.bf16.msra.mxu0 %v1074_v27  ;;  %v968_v27 = vpack.c.bf16 %v124_v18, %v122_v17  ;;  %v132_v48 = vld [vmem:[#allocation2 + $0x258] sm:$0xff]  ;;  %v129_v52 = vld [vmem:[#allocation2 + $0x240] sm:$0xff]  ;;  %v255_v54 = vld [vmem:[#allocation2 + $0x630] sm:$0xff] }
  0x59   :  { %951 = vmatpush1.bf16.msra.mxu1 %v950_v30  ;;  %1077 = vmatprep.subr.bf16.mxu0 %v1076_v31  ;;  %v252_v30 = vld [vmem:[#allocation2 + $0x618] sm:$0xff]  ;;  %v1404_v31 = vrot.slane %v395_v13, %v1375_v14  ;;  %v253_v53 = vld [vmem:[#allocation2 + $0x620] sm:$0xff]  ;;  %v976_v55 = vpack.c.bf16 %v132_v48, %v130_v47  ;;  %v259_v2 = vld [vmem:[#allocation2 + $0x650] sm:$0xff] }
  0x5a   :  { %953 = vmatprep.subr.bf16.mxu1 %v952_v35  ;;  %v1407_v35 = vrot.slane %v412_v20, %v1375_v14  ;;  %v1096_v37 = vpack.c.bf16 %v252_v30, %v250_v26  ;;  %v1098_v14 = vpack.c.bf16 %v251_v40, %v249_v39  ;;  %v136_v59 = vld [vmem:[#allocation2 + $0x278] sm:$0xff]  ;;  %v1102_v60 = vpack.c.bf16 %v255_v54, %v253_v53  ;;  %v133_v63 = vld [vmem:[#allocation2 + $0x260] sm:$0xff]  ;;  %v135_v4 = vld [vmem:[#allocation2 + $0x270] sm:$0xff] }
  0x5b   :  { %v411_v46 = vcombine.high %v1404_v31, %v1404_v31  ;;  %v257_v0 = vld [vmem:[#allocation2 + $0x640] sm:$0xff]  ;;  %v140_v8 = vld [vmem:[#allocation2 + $0x298] sm:$0xff]  ;;  %v982_v9 = vpack.c.bf16 %v135_v4, %v133_v63  ;;  %v263_v13 = vld [vmem:[#allocation2 + $0x670] sm:$0xff] }
  0x5c   :  { %1079 = vmatpush1.bf16.msra.mxu0 %v1078_v43  ;;  %v127_v43 = vld [vmem:[#allocation2 + $0x230] sm:$0xff]  ;;  %v428_v49 = vcombine.high %v1407_v35, %v1407_v35  ;;  %v261_v12 = vld [vmem:[#allocation2 + $0x660] sm:$0xff]  ;;  %v266_v17 = vld [vmem:[#allocation2 + $0x688] sm:$0xff] }
  0x5d   :  { %955 = vmatpush1.bf16.msra.mxu1 %v954_v44  ;;  %1081 = vmatprep.subr.bf16.mxu0 %v1080_v45  ;;  %v254_v44 = vld [vmem:[#allocation2 + $0x628] sm:$0xff]  ;;  %v256_v45 = vld [vmem:[#allocation2 + $0x638] sm:$0xff]  ;;  %v139_v16 = vld [vmem:[#allocation2 + $0x290] sm:$0xff] }
  0x5e   :  { %957 = vmatprep.subr.bf16.mxu1 %v956_v50  ;;  %v974_v50 = vpack.c.bf16 %v127_v43, %v125_v38  ;;  %v1100_v51 = vpack.c.bf16 %v256_v45, %v254_v44  ;;  %v268_v18 = vld [vmem:[#allocation2 + $0x698] sm:$0xff]  ;;  %v141_v24 = vld [vmem:[#allocation2 + $0x2a0] sm:$0xff]  ;;  %v143_v26 = vld [vmem:[#allocation2 + $0x2b0] sm:$0xff] }
  0x5f   :  { %v144_v20 = vld [vmem:[#allocation2 + $0x2b8] sm:$0xff]  ;;  %v1112_v23 = vpack.c.bf16 %v268_v18, %v266_v17  ;;  %v265_v25 = vld [vmem:[#allocation2 + $0x680] sm:$0xff]  ;;  %v270_v30 = vld [vmem:[#allocation2 + $0x6a8] sm:$0xff] }
  0x60   :  { %1083 = vmatpush1.bf16.msra.mxu0 %v1082_v56  ;;  %v131_v56 = vld [vmem:[#allocation2 + $0x250] sm:$0xff]  ;;  %v272_v32 = vld [vmem:[#allocation2 + $0x6b8] sm:$0xff]  ;;  %v146_v33 = vld [vmem:[#allocation2 + $0x2c8] sm:$0xff] }
  0x61   :  { %959 = vmatpush1.bf16.msra.mxu1 %v958_v57  ;;  %1085 = vmatprep.subr.bf16.mxu0 %v1084_v58  ;;  %v258_v57 = vld [vmem:[#allocation2 + $0x648] sm:$0xff]  ;;  %v260_v58 = vld [vmem:[#allocation2 + $0x658] sm:$0xff]  ;;  %v978_v61 = vpack.c.bf16 %v131_v56, %v129_v52  ;;  %v1116_v38 = vpack.c.bf16 %v272_v32, %v270_v30  ;;  %v145_v39 = vld [vmem:[#allocation2 + $0x2c0] sm:$0xff] }
  0x62   :  { %961 = vmatprep.subr.bf16.mxu1 %v960_v62  ;;  %v1104_v62 = vpack.c.bf16 %v260_v58, %v258_v57  ;;  %v269_v40 = vld [vmem:[#allocation2 + $0x6a0] sm:$0xff]  ;;  %v147_v44 = vld [vmem:[#allocation2 + $0x2d0] sm:$0xff]  ;;  %v274_v45 = vld [vmem:[#allocation2 + $0x6c8] sm:$0xff] }
  0x63   :  { %v150_v47 = vld [vmem:[#allocation2 + $0x2e8] sm:$0xff]  ;;  %v152_v48 = vld [vmem:[#allocation2 + $0x2f8] sm:$0xff]  ;;  %v273_v52 = vld [vmem:[#allocation2 + $0x6c0] sm:$0xff] }
  0x64   :  { %1087 = vmatpush1.bf16.msra.mxu0 %v1086_v5  ;;  %v262_v5 = vld [vmem:[#allocation2 + $0x668] sm:$0xff]  ;;  %v275_v53 = vld [vmem:[#allocation2 + $0x6d0] sm:$0xff]  ;;  %v996_v54 = vpack.c.bf16 %v152_v48, %v150_v47  ;;  %v280_v57 = vld [vmem:[#allocation2 + $0x6f8] sm:$0xff] }
  0x65   :  { %963 = vmatpush1.bf16.msra.mxu1 %v962_v6  ;;  %1089 = vmatprep.subr.bf16.mxu0 %v1088_v7  ;;  %v264_v6 = vld [vmem:[#allocation2 + $0x678] sm:$0xff]  ;;  %v138_v7 = vld [vmem:[#allocation2 + $0x288] sm:$0xff]  ;;  %v277_v63 = vld [vmem:[#allocation2 + $0x6e0] sm:$0xff] }
  0x66   :  { %965 = vmatprep.subr.bf16.mxu1 %v964_v11  ;;  %v1108_v10 = vpack.c.bf16 %v264_v6, %v262_v5  ;;  %v137_v11 = vld [vmem:[#allocation2 + $0x280] sm:$0xff]  ;;  %v984_v15 = vpack.c.bf16 %v140_v8, %v138_v7  ;;  %v278_v56 = vld [vmem:[#allocation2 + $0x6e8] sm:$0xff]  ;;  %v284_v5 = vld [vmem:[#allocation2 + $0x718] sm:$0xff] }
  0x67   :  { %v154_v58 = vld [vmem:[#allocation2 + $0x308] sm:$0xff]  ;;  %v160_v7 = vld [vmem:[#allocation2 + $0x338] sm:$0xff] }
  0x68   :  { %1091 = vmatpush1.bf16.msra.mxu0 %v1090_v19  ;;  %v142_v19 = vld [vmem:[#allocation2 + $0x2a8] sm:$0xff]  ;;  %v288_v17 = vld [vmem:[#allocation2 + $0x738] sm:$0xff] }
  0x69   :  { %967 = vmatpush1.bf16.msra.mxu1 %v966_v21  ;;  %1093 = vmatprep.subr.bf16.mxu0 %v1092_v22  ;;  %v1110_v21 = vpack.c.bf16 %v263_v13, %v261_v12  ;;  %v986_v22 = vpack.c.bf16 %v139_v16, %v137_v11  ;;  %v988_v28 = vpack.c.bf16 %v144_v20, %v142_v19  ;;  %v282_v4 = vld [vmem:[#allocation2 + $0x708] sm:$0xff]  ;;  %v281_v11 = vld [vmem:[#allocation2 + $0x700] sm:$0xff]  ;;  %v283_v12 = vld [vmem:[#allocation2 + $0x710] sm:$0xff] }
  0x6a   :  { %969 = vmatprep.subr.bf16.mxu1 %v968_v27  ;;  %v267_v27 = vld [vmem:[#allocation2 + $0x690] sm:$0xff]  ;;  %v158_v6 = vld [vmem:[#allocation2 + $0x328] sm:$0xff]  ;;  %v164_v19 = vld [vmem:[#allocation2 + $0x358] sm:$0xff]  ;;  %v1130_v20 = vpack.c.bf16 %v283_v12, %v281_v11 }
  0x6b   :  { %v1004_v13 = vpack.c.bf16 %v160_v7, %v158_v6  ;;  %v286_v16 = vld [vmem:[#allocation2 + $0x728] sm:$0xff]  ;;  %v292_v30 = vld [vmem:[#allocation2 + $0x758] sm:$0xff]  ;;  %v303_v11 = vld [vmem:[#allocation2 + $0x7b0] sm:$0xff] }
  0x6c   :  { %502 = vmatmul.mubr.f32.vlgmr.msra.gmra.mrb[0].mxu1 %v1384_v29  ;;  %1095 = vmatpush1.bf16.msra.mxu0 %v1094_v34  ;;  %v134_v29 = vld [vmem:[#allocation2 + $0x268] sm:$0xff]  ;;  %v148_v34 = vld [vmem:[#allocation2 + $0x2d8] sm:$0xff] }
  0x6d   :  { %971 = vmatpush1.bf16.msra.mxu1 %v970_v36  ;;  %1097 = vmatprep.subr.bf16.mxu0 %v1096_v37  ;;  %v980_v3 = vpack.c.bf16 %v136_v59, %v134_v29  ;;  %v1114_v36 = vpack.c.bf16 %v267_v27, %v265_v25  ;;  %v990_v37 = vpack.c.bf16 %v143_v26, %v141_v24  ;;  %v156_v29 = vld [vmem:[#allocation2 + $0x318] sm:$0xff]  ;;  %v162_v18 = vld [vmem:[#allocation2 + $0x348] sm:$0xff]  ;;  %v285_v24 = vld [vmem:[#allocation2 + $0x720] sm:$0xff] }
  0x6e   :  { %973 = vmatprep.subr.bf16.mxu1 %v972_v41  ;;  %572 = vmatprep.mubr.f32.mxu1 %v411_v46  ;;  %v271_v41 = vld [vmem:[#allocation2 + $0x6b0] sm:$0xff]  ;;  %v992_v43 = vpack.c.bf16 %v148_v34, %v146_v33  ;;  %v276_v46 = vld [vmem:[#allocation2 + $0x6d8] sm:$0xff]  ;;  %v1122_v59 = vpack.c.bf16 %v275_v53, %v273_v52  ;;  %v1008_v27 = vpack.c.bf16 %v164_v19, %v162_v18  ;;  %v290_v26 = vld [vmem:[#allocation2 + $0x748] sm:$0xff] }
  0x6f   :  { %644 = vmatmul.mubr.f32.vlgmr.msra.gmra.mrb[2].mxu0 %v1395_v42  ;;  %v1106_v42 = vpack.c.bf16 %v259_v2, %v257_v0  ;;  %v279_v0 = vld [vmem:[#allocation2 + $0x6f0] sm:$0xff]  ;;  %v1000_v2 = vpack.c.bf16 %v156_v29, %v154_v58  ;;  %v166_v32 = vld [vmem:[#allocation2 + $0x368] sm:$0xff]  ;;  %v168_v33 = vld [vmem:[#allocation2 + $0x378] sm:$0xff] }
  0x70   :  { %1099 = vmatpush1.bf16.msra.mxu0 %v1098_v14  ;;  %714 = vmatprep.mubr.f32.mxu0 %v428_v49  ;;  %v1118_v14 = vpack.c.bf16 %v271_v41, %v269_v40  ;;  %v994_v49 = vpack.c.bf16 %v147_v44, %v145_v39  ;;  %v1126_v8 = vpack.c.bf16 %v279_v0, %v277_v63  ;;  %v287_v25 = vld [vmem:[#allocation2 + $0x730] sm:$0xff]  ;;  %v289_v39 = vld [vmem:[#allocation2 + $0x740] sm:$0xff]  ;;  %v294_v44 = vld [vmem:[#allocation2 + $0x768] sm:$0xff] }
  0x71   :  { %975 = vmatpush1.bf16.msra.mxu1 %v974_v50  ;;  %1101 = vmatprep.subr.bf16.mxu0 %v1100_v51  ;;  %v1120_v50 = vpack.c.bf16 %v276_v46, %v274_v45  ;;  %v149_v51 = vld [vmem:[#allocation2 + $0x2e0] sm:$0xff]  ;;  %v1134_v34 = vpack.c.bf16 %v287_v25, %v285_v24  ;;  %v291_v40 = vld [vmem:[#allocation2 + $0x750] sm:$0xff]  ;;  %v1012_v41 = vpack.c.bf16 %v168_v33, %v166_v32  ;;  %v296_v45 = vld [vmem:[#allocation2 + $0x778] sm:$0xff] }
  0x72   :  { %977 = vmatprep.subr.bf16.mxu1 %v976_v55  ;;  %v151_v55 = vld [vmem:[#allocation2 + $0x2f0] sm:$0xff]  ;;  %v170_v46 = vld [vmem:[#allocation2 + $0x388] sm:$0xff]  ;;  %v172_v47 = vld [vmem:[#allocation2 + $0x398] sm:$0xff]  ;;  %v1138_v48 = vpack.c.bf16 %v291_v40, %v289_v39 }
  0x73   :  { %v295_v52 = vld [vmem:[#allocation2 + $0x770] sm:$0xff]  ;;  %v1016_v53 = vpack.c.bf16 %v172_v47, %v170_v46  ;;  %v176_v58 = vld [vmem:[#allocation2 + $0x3b8] sm:$0xff]  ;;  %v754_v32 = vld [vmem:[#allocation5 + $0x88] sm:$0xff] }
  0x74   :  { %1103 = vmatpush1.bf16.msra.mxu0 %v1102_v60  ;;  %v998_v60 = vpack.c.bf16 %v151_v55, %v149_v51  ;;  %v293_v51 = vld [vmem:[#allocation2 + $0x760] sm:$0xff]  ;;  %v298_v55 = vld [vmem:[#allocation2 + $0x788] sm:$0xff]  ;;  %v299_v63 = vld [vmem:[#allocation2 + $0x790] sm:$0xff] }
  0x75   :  { %979 = vmatpush1.bf16.msra.mxu1 %v978_v61  ;;  %1105 = vmatprep.subr.bf16.mxu0 %v1104_v62  ;;  %v1124_v61 = vpack.c.bf16 %v280_v57, %v278_v56  ;;  %v153_v62 = vld [vmem:[#allocation2 + $0x300] sm:$0xff]  ;;  %v300_v56 = vld [vmem:[#allocation2 + $0x798] sm:$0xff]  ;;  %v174_v57 = vld [vmem:[#allocation2 + $0x3a8] sm:$0xff]  ;;  %v1142_v29 = vpack.c.bf16 %v295_v52, %v293_v51 }
  0x76   :  { %981 = vmatprep.subr.bf16.mxu1 %v980_v3  ;;  %v155_v3 = vld [vmem:[#allocation2 + $0x310] sm:$0xff]  ;;  %v1020_v0 = vpack.c.bf16 %v176_v58, %v174_v57  ;;  %v180_v6 = vld [vmem:[#allocation2 + $0x3d8] sm:$0xff]  ;;  %v737_v40 = vld [vmem:[#allocation5] sm:$0xff] }
  0x77   :  { %v184_v18 = vld [vmem:[#allocation2 + $0x3f8] sm:$0xff]  ;;  %v307_v24 = vld [vmem:[#allocation2 + $0x7d0] sm:$0xff] }
  0x78   :  { %1107 = vmatpush1.bf16.msra.mxu0 %v1106_v42  ;;  %v1002_v42 = vpack.c.bf16 %v155_v3, %v153_v62  ;;  %v297_v62 = vld [vmem:[#allocation2 + $0x780] sm:$0xff]  ;;  %v302_v3 = vld [vmem:[#allocation2 + $0x7a8] sm:$0xff] }
  0x79   :  { %983 = vmatpush1.bf16.msra.mxu1 %v982_v9  ;;  %1109 = vmatprep.subr.bf16.mxu0 %v1108_v10  ;;  %v1128_v9 = vpack.c.bf16 %v284_v5, %v282_v4  ;;  %v157_v10 = vld [vmem:[#allocation2 + $0x320] sm:$0xff]  ;;  %v304_v4 = vld [vmem:[#allocation2 + $0x7b8] sm:$0xff]  ;;  %v178_v5 = vld [vmem:[#allocation2 + $0x3c8] sm:$0xff]  ;;  %v1146_v7 = vpack.c.bf16 %v299_v63, %v297_v62 }
  0x7a   :  { %985 = vmatprep.subr.bf16.mxu1 %v984_v15  ;;  %v159_v15 = vld [vmem:[#allocation2 + $0x330] sm:$0xff]  ;;  %v1024_v12 = vpack.c.bf16 %v180_v6, %v178_v5  ;;  %v745_v63 = vld [vmem:[#allocation5 + $0x40] sm:$0xff]  ;;  %v748_v6 = vld [vmem:[#allocation5 + $0x58] sm:$0xff] }
  0x7b   :  { %v747_v5 = vld [vmem:[#allocation5 + $0x50] sm:$0xff] }
  0x7c   :  { %1111 = vmatpush1.bf16.msra.mxu0 %v1110_v21  ;;  %v1006_v21 = vpack.c.bf16 %v159_v15, %v157_v10  ;;  %v301_v10 = vld [vmem:[#allocation2 + $0x7a0] sm:$0xff]  ;;  %v306_v15 = vld [vmem:[#allocation2 + $0x7c8] sm:$0xff] }
  0x7d   :  { %987 = vmatpush1.bf16.msra.mxu1 %v986_v22  ;;  %1113 = vmatprep.subr.bf16.mxu0 %v1112_v23  ;;  %v1132_v22 = vpack.c.bf16 %v288_v17, %v286_v16  ;;  %v161_v23 = vld [vmem:[#allocation2 + $0x340] sm:$0xff]  ;;  %v308_v16 = vld [vmem:[#allocation2 + $0x7d8] sm:$0xff]  ;;  %v182_v17 = vld [vmem:[#allocation2 + $0x3e8] sm:$0xff]  ;;  %v1150_v19 = vpack.c.bf16 %v303_v11, %v301_v10 }
  0x7e   :  { %989 = vmatprep.subr.bf16.mxu1 %v988_v28  ;;  %v163_v28 = vld [vmem:[#allocation2 + $0x350] sm:$0xff]  ;;  %v1028_v25 = vpack.c.bf16 %v184_v18, %v182_v17  ;;  %v749_v11 = vld [vmem:[#allocation5 + $0x60] sm:$0xff]  ;;  %v768_v17 = vld [vmem:[#allocation5 + $0xf8] sm:$0xff] }
  0x80   :  { %1115 = vmatpush1.bf16.msra.mxu0 %v1114_v36  ;;  %v1010_v36 = vpack.c.bf16 %v163_v28, %v161_v23  ;;  %v305_v23 = vld [vmem:[#allocation2 + $0x7c0] sm:$0xff]  ;;  %v310_v28 = vld [vmem:[#allocation2 + $0x7e8] sm:$0xff] }
  0x81   :  { %991 = vmatpush1.bf16.msra.mxu1 %v990_v37  ;;  %1117 = vmatprep.subr.bf16.mxu0 %v1116_v38  ;;  %v1136_v37 = vpack.c.bf16 %v292_v30, %v290_v26  ;;  %v165_v38 = vld [vmem:[#allocation2 + $0x360] sm:$0xff]  ;;  %v312_v26 = vld [vmem:[#allocation2 + $0x7f8] sm:$0xff]  ;;  %v1154_v33 = vpack.c.bf16 %v307_v24, %v305_v23  ;;  %v729_v24 = vsub.s32 1, %v1372_v1 }
  0x82   :  { %993 = vmatprep.subr.bf16.mxu1 %v992_v43  ;;  %v167_v43 = vld [vmem:[#allocation2 + $0x370] sm:$0xff]  ;;  %v753_v30 = vld [vmem:[#allocation5 + $0x80] sm:$0xff] }
  0x83   :  { %v1160_v39 = vpack.c.bf16 %v754_v32, %v753_v30  ;;  %v721_v23 = vld [vmem:[%s1441_s4] sm:$0x3] }
  0x84   :  { %1119 = vmatpush1.bf16.msra.mxu0 %v1118_v14  ;;  %v1014_v14 = vpack.c.bf16 %v167_v43, %v165_v38  ;;  %v311_v38 = vld [vmem:[#allocation2 + $0x7f0] sm:$0xff] }
  0x85   :  { %995 = vmatpush1.bf16.msra.mxu1 %v994_v49  ;;  %1121 = vmatprep.subr.bf16.mxu0 %v1120_v50  ;;  %v1140_v49 = vpack.c.bf16 %v296_v45, %v294_v44  ;;  %v169_v50 = vld [vmem:[#allocation2 + $0x380] sm:$0xff]  ;;  %v755_v43 = vld [vmem:[#allocation5 + $0x90] sm:$0xff]  ;;  %v756_v44 = vld [vmem:[#allocation5 + $0x98] sm:$0xff] }
  0x86   :  { %997 = vmatprep.subr.bf16.mxu1 %v996_v54  ;;  %v171_v54 = vld [vmem:[#allocation2 + $0x390] sm:$0xff]  ;;  %v1164_v47 = vpack.c.bf16 %v756_v44, %v755_v43 }
  0x88   :  { %1123 = vmatpush1.bf16.msra.mxu0 %v1122_v59  ;;  %v1018_v59 = vpack.c.bf16 %v171_v54, %v169_v50  ;;  %v758_v50 = vld [vmem:[#allocation5 + $0xa8] sm:$0xff] }
  0x89   :  { %999 = vmatpush1.bf16.msra.mxu1 %v998_v60  ;;  %1125 = vmatprep.subr.bf16.mxu0 %v1124_v61  ;;  %v1144_v60 = vpack.c.bf16 %v300_v56, %v298_v55  ;;  %v173_v61 = vld [vmem:[#allocation2 + $0x3a0] sm:$0xff]  ;;  %v742_v54 = vld [vmem:[#allocation5 + $0x28] sm:$0xff]  ;;  %v759_v55 = vld [vmem:[#allocation5 + $0xb0] sm:$0xff] }
  0x8a   :  { %1001 = vmatprep.subr.bf16.mxu1 %v1000_v2  ;;  %v175_v2 = vld [vmem:[#allocation2 + $0x3b0] sm:$0xff]  ;;  %v760_v56 = vld [vmem:[#allocation5 + $0xb8] sm:$0xff] }
  0x8b   :  { %v1172_v58 = vpack.c.bf16 %v760_v56, %v759_v55 }
  0x8c   :  { %1127 = vmatpush1.bf16.msra.mxu0 %v1126_v8  ;;  %v1022_v8 = vpack.c.bf16 %v175_v2, %v173_v61  ;;  %v762_v61 = vld [vmem:[#allocation5 + $0xc8] sm:$0xff] }
  0x8d   :  { %1003 = vmatpush1.bf16.msra.mxu1 %v1002_v42  ;;  %1129 = vmatprep.subr.bf16.mxu0 %v1128_v9  ;;  %v1148_v42 = vpack.c.bf16 %v304_v4, %v302_v3  ;;  %v177_v9 = vld [vmem:[#allocation2 + $0x3c0] sm:$0xff]  ;;  %v764_v3 = vld [vmem:[#allocation5 + $0xd8] sm:$0xff] }
  0x8e   :  { %1005 = vmatprep.subr.bf16.mxu1 %v1004_v13  ;;  %v179_v13 = vld [vmem:[#allocation2 + $0x3d0] sm:$0xff] }
  0x90   :  { %1131 = vmatpush1.bf16.msra.mxu0 %v1130_v20  ;;  %v1026_v20 = vpack.c.bf16 %v179_v13, %v177_v9 }
  0x91   :  { %1007 = vmatpush1.bf16.msra.mxu1 %v1006_v21  ;;  %1133 = vmatprep.subr.bf16.mxu0 %v1132_v22  ;;  %v1152_v21 = vpack.c.bf16 %v308_v16, %v306_v15  ;;  %v181_v22 = vld [vmem:[#allocation2 + $0x3e0] sm:$0xff]  ;;  %v767_v16 = vld [vmem:[#allocation5 + $0xf0] sm:$0xff] }
  0x92   :  { %1009 = vmatprep.subr.bf16.mxu1 %v1008_v27  ;;  %v183_v27 = vld [vmem:[#allocation2 + $0x3f0] sm:$0xff]  ;;  %v1188_v18 = vpack.c.bf16 %v768_v17, %v767_v16 }
  0x94   :  { %1135 = vmatpush1.bf16.msra.mxu0 %v1134_v34  ;;  %v1030_v34 = vpack.c.bf16 %v183_v27, %v181_v22  ;;  %v725_v22 = vsub.s32 0, %v1372_v1  ;;  %v864_v1 = vld [vmem:[%s1443_s6] ss:$0 sm:$0xff] }
  0x95   :  { %1011 = vmatpush1.bf16.msra.mxu1 %v1010_v36  ;;  %1137 = vmatprep.subr.bf16.mxu0 %v1136_v37  ;;  %v1156_v36 = vpack.c.bf16 %v312_v26, %v310_v28  ;;  %v309_v37 = vld [vmem:[#allocation2 + $0x7e0] sm:$0xff] }
  0x96   :  { %1013 = vmatprep.subr.bf16.mxu1 %v1012_v41  ;;  %v738_v41 = vld [vmem:[#allocation5 + $0x8] sm:$0xff]  ;;  %v1158_v45 = vpack.c.bf16 %v311_v38, %v309_v37  ;;  %v726_v30 = vrot.slane %v721_v23, %v725_v22 }
  0x97   :  { %v1162_v46 = vpack.c.bf16 %v738_v41, %v737_v40 }
  0x98   :  { %1139 = vmatpush1.bf16.msra.mxu0 %v1138_v48  ;;  %v739_v48 = vld [vmem:[#allocation5 + $0x10] sm:$0xff] }
  0x99   :  { %1015 = vmatpush1.bf16.msra.mxu1 %v1014_v14  ;;  %1141 = vmatprep.subr.bf16.mxu0 %v1140_v49  ;;  %v740_v14 = vld [vmem:[#allocation5 + $0x18] sm:$0xff]  ;;  %v757_v49 = vld [vmem:[#allocation5 + $0xa0] sm:$0xff] }
  0x9a   :  { %1017 = vmatprep.subr.bf16.mxu1 %v1016_v53  ;;  %v1166_v51 = vpack.c.bf16 %v740_v14, %v739_v48  ;;  %v1168_v52 = vpack.c.bf16 %v758_v50, %v757_v49  ;;  %v741_v53 = vld [vmem:[#allocation5 + $0x20] sm:$0xff] }
  0x9b   :  { %v1170_v57 = vpack.c.bf16 %v742_v54, %v741_v53 }
  0x9c   :  { %1143 = vmatpush1.bf16.msra.mxu0 %v1142_v29  ;;  %v743_v29 = vld [vmem:[#allocation5 + $0x30] sm:$0xff] }
  0x9d   :  { %1019 = vmatpush1.bf16.msra.mxu1 %v1018_v59  ;;  %1145 = vmatprep.subr.bf16.mxu0 %v1144_v60  ;;  %v744_v59 = vld [vmem:[#allocation5 + $0x38] sm:$0xff]  ;;  %v761_v60 = vld [vmem:[#allocation5 + $0xc0] sm:$0xff] }
  0x9e   :  { %1021 = vmatprep.subr.bf16.mxu1 %v1020_v0  ;;  %v1176_v62 = vpack.c.bf16 %v762_v61, %v761_v60  ;;  %v746_v0 = vld [vmem:[#allocation5 + $0x48] sm:$0xff] }
  0x9f   :  { %v1178_v2 = vpack.c.bf16 %v746_v0, %v745_v63 }
  0xa0   :  { %1147 = vmatpush1.bf16.msra.mxu0 %v1146_v7  ;;  %v1182_v7 = vpack.c.bf16 %v748_v6, %v747_v5 }
  0xa1   :  { %1023 = vmatpush1.bf16.msra.mxu1 %v1022_v8  ;;  %1149 = vmatprep.subr.bf16.mxu0 %v1148_v42  ;;  %v765_v8 = vld [vmem:[#allocation5 + $0xe0] sm:$0xff]  ;;  %v766_v42 = vld [vmem:[#allocation5 + $0xe8] sm:$0xff] }
  0xa2   :  { %1025 = vmatprep.subr.bf16.mxu1 %v1024_v12  ;;  %v1184_v10 = vpack.c.bf16 %v766_v42, %v765_v8  ;;  %v750_v12 = vld [vmem:[#allocation5 + $0x68] sm:$0xff] }
  0xa3   :  { %v1186_v15 = vpack.c.bf16 %v750_v12, %v749_v11 }
  0xa4   :  { %1151 = vmatpush1.bf16.msra.mxu0 %v1150_v19  ;;  %v751_v19 = vld [vmem:[#allocation5 + $0x70] sm:$0xff] }
  0xa5   :  { %1027 = vmatpush1.bf16.msra.mxu1 %v1026_v20  ;;  %1153 = vmatprep.subr.bf16.mxu0 %v1152_v21  ;;  %v752_v20 = vld [vmem:[#allocation5 + $0x78] sm:$0xff] }
  0xa6   :  { %1029 = vmatprep.subr.bf16.mxu1 %v1028_v25  ;;  %v1190_v21 = vpack.c.bf16 %v752_v20, %v751_v19 }
  0xa8   :  { %1155 = vmatpush1.bf16.msra.mxu0 %v1154_v33  ;;  %v730_v33 = vrot.slane %v721_v23, %v729_v24 }
  0xa9   :  { %1031 = vmatpush1.bf16.msra.mxu1 %v1030_v34  ;;  %1157 = vmatprep.subr.bf16.mxu0 %v1156_v36 }
  0xaa   :  { %1161 = vmatprep.subr.bf16.mxu1 %v1160_v39 }
  0xac   :  { %573 = vmatmul.mubr.f32.vlgmr.msra.gmra.mrb[0].mxu1 %v1404_v31  ;;  %1159 = vmatpush1.bf16.msra.mxu0 %v1158_v45  ;;  %v1174_v31 = vpack.c.bf16 %v744_v59, %v743_v29 }
  0xad   :  { %1163 = vmatpush3.bf16.msra.mxu1 %v1162_v46 }
  0xae   :  { %1165 = vmatprep.subr.bf16.mxu1 %v1164_v47 }
  0xaf   :  { %715 = vmatmul.mubr.f32.vlgmr.msra.gmra.mrb[2].mxu0 %v1407_v35  ;;  %v763_v35 = vld [vmem:[#allocation5 + $0xd0] sm:$0xff] }
  0xb0   :  { %v1180_v4 = vpack.c.bf16 %v764_v3, %v763_v35 }
  0xb1   :  { %1167 = vmatpush3.bf16.msra.mxu1 %v1166_v51 }
  0xb2   :  { %1169 = vmatprep.subr.bf16.mxu1 %v1168_v52 }
  0xb5   :  { %1171 = vmatpush3.bf16.msra.mxu1 %v1170_v57 }
  0xb6   :  { %1173 = vmatprep.subr.bf16.mxu1 %v1172_v58 }
  0xb9   :  { %1175 = vmatpush3.bf16.msra.mxu1 %v1174_v31 }
  0xba   :  { %1177 = vmatprep.subr.bf16.mxu1 %v1176_v62 }
  0xbd   :  { %1179 = vmatpush3.bf16.msra.mxu1 %v1178_v2 }
  0xbe   :  { %1181 = vmatprep.subr.bf16.mxu1 %v1180_v4 }
  0xc1   :  { %1183 = vmatpush3.bf16.msra.mxu1 %v1182_v7 }
  0xc2   :  { %1185 = vmatprep.subr.bf16.mxu1 %v1184_v10 }
  0xc5   :  { %1187 = vmatpush3.bf16.msra.mxu1 %v1186_v15 }
  0xc6   :  { %1189 = vmatprep.subr.bf16.mxu1 %v1188_v18 }
  0xc9   :  { %1191 = vmatpush3.bf16.msra.mxu1 %v1190_v21 }
 0x102   :  { %v388_v9 = vpop.f32.mrb[0].mxu0 }
 0x103   :  { %v390_v13 = vpop.f32.mrb[1].mxu0 }
 0x17f   :  { %v574_v25 = vpop.f32.mrb[0].mxu1 }
 0x180   :  { %v1192_v27 = vadd.f32 %v574_v25, %v388_v9  ;;  %v576_v28 = vpop.f32.mrb[1].mxu1 }
 0x181   :  { %v1194_v26 = vadd.f32 %v576_v28, %v390_v13 }
 0x182   :  { %v716_v32 = vpop.f32.mrb[2].mxu0 }
 0x183   :  { %v1193_v34 = vadd.f32 %v1192_v27, %v716_v32  ;;  %v718_v36 = vpop.f32.mrb[3].mxu0 }
 0x184   :  { %v1195_v37 = vadd.f32 %v1194_v26, %v718_v36 }
 0x185   :  { %v733_v38 = vadd.f32 %v1193_v34, %v726_v30 }
 0x186   :  { %v734_v39 = vadd.f32 %v1195_v37, %v730_v33 }
 0x187   :  { %v735_v41 = vmax.f32 %v733_v38, 0.0 }
 0x188   :  { %v736_v40 = vmax.f32 %v734_v39, 0.0 }
 0x18a   :  { %840 = vmatprep.mubr.f32.mxu1 %v736_v40 }
 0x18b   :  { %841 = vmatmul.mubr.f32.vlgmr.msra.gmra.mrb[2].mxu1 %v735_v41 }
 0x25e   :  { %v897_v43 = vpop.f32.mrb[2].mxu1 }
 0x25f   :  { %v898_v44 = vpop.f32.mrb[3].mxu1 }
 0x260   :  { %v899_v45 = vadd.f32 %v898_v44, %v897_v43 }
 0x262   :  { %v843_v46 = vadd.f32 %v899_v45, %v864_v1 }
 0x264   :  { %846 = vst [vmem:[#allocation7] sm:$0x3] %v843_v46 }
 0x265   :  { %1266 = shalt.err (!%p1263_p6)
}
 0x266   :  { %s1267_s23 = scalar_lea.hbm %s1444_s7, 32 }
 0x267   :  { %p1268_p7 = scmp.ne.s32.totalorder %s1444_s7, %s1267_s23  ;;  %p1271_p8 = scmp.lt.u32.totalorder %s1267_s23, %s1444_s7 }
 0x269   :  { %p1273_p9 = pnand %p1271_p8, %p1268_p7 }
 0x26b   :  { %1276 = shalt.err (!%p1273_p9)
}
 0x26c   :  { %856 = dma.vmem_to_hbm [thread:$0]  %s854_s19, 32, %s1444_s7, [#allocation4]  }
 0x26d   :  { %1281 = dma.done.wait [#allocation4], 32  }
 0x26e   :  { %1282 = vsyncadd [#allocation4], 4294967264 }
 0x26f   :  { %860 = vsyncpa [#allocation3], 1 }
 0x270   :  { %861 = vsyncpa [#allocation6], 1 }
 0x271   :  { %862 = vsyncpa [#allocation4], 1 }

</bundles_post_ra>
